<compile_context>
chip_gen: v7x
topology: tpu7x:2x2x1
jax: 0.10.0
libtpu: 0.0.40
codegen_flags: <defaults>
</compile_context>

<pallas_src>
import functools
import math

import jax
import jax.numpy as jnp
from jax import lax
from jax.experimental import pallas as pl
from jax.experimental.pallas import tpu as pltpu

_NEG_INF = -1e30  # large finite negative: exp underflows to 0, never NaN


def _flash_mha_kernel(xq_ref, xkv_ref, wq_ref, wkv_ref, o_ref,
                      q_scr, m_scr, l_scr, acc_scr, *, num_heads, d_out):
    """One grid step = (batch b, query block qi, kv block ki).

    xq_ref : (1, TQ, d_in)        query-side rows of x
    xkv_ref: (1, TK, d_in)        key/value-side rows of x
    wq_ref : (d_in, H*d_out)      all heads' Q weights, fused
    wkv_ref: (d_in, 2*H*d_out)    all heads' K then V weights, fused
    o_ref  : (1, TQ, H*d_out)     concatenated per-head outputs
    scratch: q_scr (TQ, H*d_out), m_scr/l_scr (TQ, H), acc_scr (TQ, H*d_out)
    """
    qi = pl.program_id(1)
    ki = pl.program_id(2)
    num_kv = pl.num_programs(2)

    scale = 1.0 / math.sqrt(d_out)

    @pl.when(ki == 0)
    def _init():
        # One MXU op projects Q for all heads; scale folded into Q here.
        q = jnp.dot(xq_ref[0], wq_ref[...], preferred_element_type=jnp.float32)
        q_scr[...] = q * scale
        m_scr[...] = jnp.full_like(m_scr, _NEG_INF)
        l_scr[...] = jnp.zeros_like(l_scr)
        acc_scr[...] = jnp.zeros_like(acc_scr)

    def _update(masked):
        # One MXU op projects K and V for all heads of this kv block.
        kv = jnp.dot(xkv_ref[0], wkv_ref[...], preferred_element_type=jnp.float32)
        tq = q_scr.shape[0]
        tk = kv.shape[0]
        if masked:
            # Diagonal block (ki == qi): the causal mask depends only on the
            # local offsets, so no global index arithmetic is needed.
            row = lax.broadcasted_iota(jnp.int32, (tq, tk), 0)
            col = lax.broadcasted_iota(jnp.int32, (tq, tk), 1)
            causal = col <= row
        for h in range(num_heads):
            sl = slice(h * d_out, (h + 1) * d_out)
            q_h = q_scr[:, sl]                                    # (TQ, d_out), pre-scaled
            k_h = kv[:, sl]                                       # (TK, d_out)
            v_h = kv[:, num_heads * d_out + h * d_out:
                        num_heads * d_out + (h + 1) * d_out]      # (TK, d_out)
            # q @ k^T without materializing the transpose.
            s = lax.dot_general(q_h, k_h, (((1,), (1,)), ((), ())),
                                preferred_element_type=jnp.float32)  # (TQ, TK)
            if masked:
                s = jnp.where(causal, s, _NEG_INF)
            m_prev = m_scr[:, h:h + 1]                            # (TQ, 1)
            m_new = jnp.maximum(m_prev, jnp.max(s, axis=-1, keepdims=True))
            alpha = jnp.exp(m_prev - m_new)
            p = jnp.exp(s - m_new)
            l_scr[:, h:h + 1] = alpha * l_scr[:, h:h + 1] + jnp.sum(
                p, axis=-1, keepdims=True)
            acc_scr[:, sl] = alpha * acc_scr[:, sl] + jnp.dot(
                p, v_h, preferred_element_type=jnp.float32)
            m_scr[:, h:h + 1] = m_new

    # Causal block structure (TQ == TK):
    #   ki > qi : fully masked  -> skipped entirely (no MXU/VPU work)
    #   ki < qi : fully visible -> no mask is built
    #   ki == qi: diagonal      -> local triangular mask
    @pl.when(ki < qi)
    def _off_diag():
        _update(masked=False)

    @pl.when(ki == qi)
    def _diag():
        _update(masked=True)

    @pl.when(ki == num_kv - 1)
    def _finalize():
        # Per-tile normalization (TQ x H reciprocals instead of a T x T divide).
        # approx=True is the prod choice; exact kept here for the tight
        # reference tolerance below.
        chunks = []
        for h in range(num_heads):
            sl = slice(h * d_out, (h + 1) * d_out)
            inv = pl.reciprocal(l_scr[:, h:h + 1], approx=False)
            chunks.append(acc_scr[:, sl] * inv)
        out = chunks[0] if num_heads == 1 else jnp.concatenate(chunks, axis=-1)
        o_ref[0] = out.astype(o_ref.dtype)


def multi_head_attention(x, wq, wk, wv, *, block_size=128):
    """x: (B, T, d_in); wq/wk/wv: (H, d_in, d_out) -> (B, T, H*d_out)."""
    B, T, d_in = x.shape
    H, _, d_out = wq.shape

    blk = min(block_size, T)
    assert T % blk == 0, "T must be a multiple of the block size"
    num_blocks = T // blk

    # Fuse per-head weights into wide matmuls:
    #   wq_cat : (d_in, H*d_out)     -> all heads' Q in one MXU op
    #   wkv_cat: (d_in, 2*H*d_out)   -> all heads' K and V in one MXU op
    wq_cat = jnp.transpose(wq, (1, 0, 2)).reshape(d_in, H * d_out)
    wk_cat = jnp.transpose(wk, (1, 0, 2)).reshape(d_in, H * d_out)
    wv_cat = jnp.transpose(wv, (1, 0, 2)).reshape(d_in, H * d_out)
    wkv_cat = jnp.concatenate([wk_cat, wv_cat], axis=-1)

    kernel = functools.partial(_flash_mha_kernel, num_heads=H, d_out=d_out)

    itemsize = jnp.dtype(x.dtype).itemsize
    cost = pl.CostEstimate(
        flops=int(2 * B * T * d_in * 3 * H * d_out        # fused QKV projections
                  + 2 * 2 * B * H * T * T * d_out // 2),  # QK^T + PV (causal ~1/2)
        transcendentals=int(B * H * T * T // 2),
        bytes_accessed=int((2 * x.size + wq_cat.size + wkv_cat.size) * itemsize
                           + B * T * H * d_out * itemsize),
    )

    return pl.pallas_call(
        kernel,
        out_shape=jax.ShapeDtypeStruct((B, T, H * d_out), x.dtype),
        grid_spec=pltpu.PrefetchScalarGridSpec(
            num_scalar_prefetch=0,
            grid=(B, num_blocks, num_blocks),
            in_specs=[
                pl.BlockSpec((1, blk, d_in), lambda b, qi, ki: (b, qi, 0)),      # x (Q rows)
                pl.BlockSpec((1, blk, d_in), lambda b, qi, ki: (b, ki, 0)),      # x (K/V rows)
                pl.BlockSpec((d_in, H * d_out), lambda b, qi, ki: (0, 0)),       # Wq fused
                pl.BlockSpec((d_in, 2 * H * d_out), lambda b, qi, ki: (0, 0)),   # Wk|Wv fused
            ],
            out_specs=pl.BlockSpec((1, blk, H * d_out),
                                   lambda b, qi, ki: (b, qi, 0)),
            scratch_shapes=[
                pltpu.VMEM((blk, H * d_out), jnp.float32),   # cached scaled Q
                pltpu.VMEM((blk, H), jnp.float32),           # running max m
                pltpu.VMEM((blk, H), jnp.float32),           # running sum l
                pltpu.VMEM((blk, H * d_out), jnp.float32),   # output accumulator
            ],
        ),
        compiler_params=pltpu.CompilerParams(
            dimension_semantics=("parallel", "parallel", "arbitrary"),
        ),
        cost_estimate=cost,
    )(x, x, wq_cat, wkv_cat)


def _reference(x, wq, wk, wv):
    """Pure-JAX reference matching the PyTorch forward (dropout=0, eval)."""
    B, T, _ = x.shape
    H, _, d_out = wq.shape
    mask = jnp.triu(jnp.ones((T, T), dtype=bool), k=1)
    outs = []
    for h in range(H):
        q = x @ wq[h]
        k = x @ wk[h]
        v = x @ wv[h]
        scores = jnp.einsum("btd,bsd->bts", q, k)
        scores = jnp.where(mask[None], -jnp.inf, scores)
        attn = jax.nn.softmax(scores / math.sqrt(d_out), axis=-1)
        outs.append(jnp.einsum("bts,bsd->btd", attn, v))
    return jnp.concatenate(outs, axis=-1)


if __name__ == "__main__":
    # --- Test 1: exact shapes from the PyTorch module's example -------------
    inputs = jnp.array(
        [[0.43, 0.15, 0.89],
         [0.55, 0.87, 0.66],
         [0.57, 0.85, 0.64],
         [0.22, 0.58, 0.33],
         [0.77, 0.25, 0.10],
         [0.05, 0.80, 0.55]], dtype=jnp.float32)
    x1 = jnp.stack([inputs, inputs], axis=0)          # (2, 6, 3)
    d_in, d_out, num_heads = 3, 2, 2
    k0, k1, k2 = jax.random.split(jax.random.PRNGKey(0), 3)
    wq1 = jax.random.normal(k0, (num_heads, d_in, d_out), jnp.float32) * 0.5
    wk1 = jax.random.normal(k1, (num_heads, d_in, d_out), jnp.float32) * 0.5
    wv1 = jax.random.normal(k2, (num_heads, d_in, d_out), jnp.float32) * 0.5

    out1 = jax.block_until_ready(multi_head_attention(x1, wq1, wk1, wv1))
    ref1 = _reference(x1, wq1, wk1, wv1)
    assert out1.shape == (2, 6, num_heads * d_out), out1.shape
    assert jnp.allclose(out1, ref1, atol=1e-4, rtol=1e-4), (out1, ref1)

    # --- Test 2: multi-block causal path (skip / off-diag / diag blocks) ----
    B2, T2, d_in2, d_out2, H2 = 2, 256, 8, 64, 2
    kx, kq, kk, kv = jax.random.split(jax.random.PRNGKey(1), 4)
    ws = 1.0 / math.sqrt(d_in2)
    x2 = jax.random.normal(kx, (B2, T2, d_in2), jnp.float32)
    wq2 = jax.random.normal(kq, (H2, d_in2, d_out2), jnp.float32) * ws
    wk2 = jax.random.normal(kk, (H2, d_in2, d_out2), jnp.float32) * ws
    wv2 = jax.random.normal(kv, (H2, d_in2, d_out2), jnp.float32) * ws

    out2 = jax.block_until_ready(multi_head_attention(x2, wq2, wk2, wv2))
    ref2 = _reference(x2, wq2, wk2, wv2)
    assert out2.shape == (B2, T2, H2 * d_out2), out2.shape
    assert jnp.allclose(out2, ref2, atol=1e-4, rtol=1e-4), float(
        jnp.max(jnp.abs(out2 - ref2)))

    print("KERNEL_OK")
</pallas_src>

<mosaic_0001>
module attributes {stable_mosaic.version = 11 : i64} {
  func.func @_flash_mha_kernel(%arg0: i32, %arg1: i32, %arg2: i32, %arg3: memref<1x6x3xf32, #tpu.memory_space<vmem>>, %arg4: memref<1x6x3xf32, #tpu.memory_space<vmem>>, %arg5: memref<3x4xf32, #tpu.memory_space<vmem>>, %arg6: memref<3x8xf32, #tpu.memory_space<vmem>>, %arg7: memref<1x6x4xf32, #tpu.memory_space<vmem>>, %arg8: memref<6x4xf32, #tpu.memory_space<vmem>>, %arg9: memref<6x2xf32, #tpu.memory_space<vmem>>, %arg10: memref<6x2xf32, #tpu.memory_space<vmem>>, %arg11: memref<6x4xf32, #tpu.memory_space<vmem>>) attributes {dimension_semantics = [#tpu.dimension_semantics<parallel>, #tpu.dimension_semantics<parallel>, #tpu.dimension_semantics<arbitrary>], iteration_bounds = array<i64: 2, 1, 1>, scalar_prefetch = 0 : i64, scratch_operands = 4 : i64, tpu.core_type = #tpu.core_type<tc>, window_params = [{transform_indices = @transform_0, window_bounds = array<i64: 1, 6, 3>}, {transform_indices = @transform_1, window_bounds = array<i64: 1, 6, 3>}, {pipeline_mode = #tpu.pipeline_mode<synchronous>, transform_indices = @transform_2, window_bounds = array<i64: 3, 4>}, {pipeline_mode = #tpu.pipeline_mode<synchronous>, transform_indices = @transform_3, window_bounds = array<i64: 3, 8>}, {transform_indices = @transform_4, window_bounds = array<i64: 1, 6, 4>}]} {
    %c0_i32 = arith.constant 0 : i32
    %0 = arith.cmpi eq, %arg2, %c0_i32 : i32
    %1 = arith.extui %0 : i1 to i32
    %c0_i32_0 = arith.constant 0 : i32
    %2 = arith.cmpi ne, %1, %c0_i32_0 : i32
    scf.if %2 {
      %c0 = arith.constant 0 : index
      %c0_5 = arith.constant 0 : index
      %c0_6 = arith.constant 0 : index
      %12 = vector.load %arg3[%c0, %c0_5, %c0_6] : memref<1x6x3xf32, #tpu.memory_space<vmem>>, vector<1x6x3xf32>
      %13 = vector.shape_cast %12 : vector<1x6x3xf32> to vector<6x3xf32>
      %c0_7 = arith.constant 0 : index
      %c0_8 = arith.constant 0 : index
      %14 = vector.load %arg5[%c0_7, %c0_8] : memref<3x4xf32, #tpu.memory_space<vmem>>, vector<3x4xf32>
      %cst = arith.constant dense<0.000000e+00> : vector<6x4xf32>
      %15 = tpu.matmul %13, %14, %cst {dimension_numbers = #tpu.dot_dimension_numbers<[1], [0], [0], [1], [0, 0, 1, 1], [], []>} : vector<6x3xf32>, vector<3x4xf32>, vector<6x4xf32> -> vector<6x4xf32>
      %cst_9 = arith.constant 0.707106769 : f32
      %16 = vector.broadcast %cst_9 : f32 to vector<6x4xf32>
      %17 = arith.mulf %15, %16 : vector<6x4xf32>
      %c0_10 = arith.constant 0 : index
      %c0_11 = arith.constant 0 : index
      %18 = vector.load %arg8[%c0_10, %c0_11] : memref<6x4xf32, #tpu.memory_space<vmem>>, vector<6x4xf32>
      tpu.vector_store %arg8[%c0_10, %c0_11], %17 {strides = array<i32>} : memref<6x4xf32, #tpu.memory_space<vmem>>, vector<6x4xf32>,
      %cst_12 = arith.constant -1.000000e+30 : f32
      %19 = vector.broadcast %cst_12 : f32 to vector<6x2xf32>
      %c0_13 = arith.constant 0 : index
      %c0_14 = arith.constant 0 : index
      %20 = vector.load %arg9[%c0_13, %c0_14] : memref<6x2xf32, #tpu.memory_space<vmem>>, vector<6x2xf32>
      tpu.vector_store %arg9[%c0_13, %c0_14], %19 {strides = array<i32>} : memref<6x2xf32, #tpu.memory_space<vmem>>, vector<6x2xf32>,
      %cst_15 = arith.constant 0.000000e+00 : f32
      %21 = vector.broadcast %cst_15 : f32 to vector<6x2xf32>
      %c0_16 = arith.constant 0 : index
      %c0_17 = arith.constant 0 : index
      %22 = vector.load %arg10[%c0_16, %c0_17] : memref<6x2xf32, #tpu.memory_space<vmem>>, vector<6x2xf32>
      tpu.vector_store %arg10[%c0_16, %c0_17], %21 {strides = array<i32>} : memref<6x2xf32, #tpu.memory_space<vmem>>, vector<6x2xf32>,
      %cst_18 = arith.constant 0.000000e+00 : f32
      %23 = vector.broadcast %cst_18 : f32 to vector<6x4xf32>
      %c0_19 = arith.constant 0 : index
      %c0_20 = arith.constant 0 : index
      %24 = vector.load %arg11[%c0_19, %c0_20] : memref<6x4xf32, #tpu.memory_space<vmem>>, vector<6x4xf32>
      tpu.vector_store %arg11[%c0_19, %c0_20], %23 {strides = array<i32>} : memref<6x4xf32, #tpu.memory_space<vmem>>, vector<6x4xf32>,
    } else {
    }
    %3 = arith.cmpi slt, %arg2, %arg1 : i32
    %4 = arith.extui %3 : i1 to i32
    %c0_i32_1 = arith.constant 0 : i32
    %5 = arith.cmpi ne, %4, %c0_i32_1 : i32
    scf.if %5 {
      %c0 = arith.constant 0 : index
      %c0_5 = arith.constant 0 : index
      %c0_6 = arith.constant 0 : index
      %12 = vector.load %arg4[%c0, %c0_5, %c0_6] : memref<1x6x3xf32, #tpu.memory_space<vmem>>, vector<1x6x3xf32>
      %13 = vector.shape_cast %12 : vector<1x6x3xf32> to vector<6x3xf32>
      %c0_7 = arith.constant 0 : index
      %c0_8 = arith.constant 0 : index
      %14 = vector.load %arg6[%c0_7, %c0_8] : memref<3x8xf32, #tpu.memory_space<vmem>>, vector<3x8xf32>
      %cst = arith.constant dense<0.000000e+00> : vector<6x8xf32>
      %15 = tpu.matmul %13, %14, %cst {dimension_numbers = #tpu.dot_dimension_numbers<[1], [0], [0], [1], [0, 0, 1, 1], [], []>} : vector<6x3xf32>, vector<3x8xf32>, vector<6x8xf32> -> vector<6x8xf32>
      %c0_9 = arith.constant 0 : index
      %c0_10 = arith.constant 0 : index
      %16 = vector.load %arg8[%c0_9, %c0_10] : memref<6x4xf32, #tpu.memory_space<vmem>>, vector<6x2xf32>
      %17 = vector.extract_strided_slice %15 {offsets = [0, 0], sizes = [6, 2], strides = [1, 1]} : vector<6x8xf32> to vector<6x2xf32>
      %18 = vector.extract_strided_slice %15 {offsets = [0, 4], sizes = [6, 2], strides = [1, 1]} : vector<6x8xf32> to vector<6x2xf32>
      %cst_11 = arith.constant dense<0.000000e+00> : vector<6x6xf32>
      %19 = tpu.matmul %16, %17, %cst_11 {dimension_numbers = #tpu.dot_dimension_numbers<[1], [1], [0], [0], [0, 0, 1, 0], [], []>} : vector<6x2xf32>, vector<6x2xf32>, vector<6x6xf32> -> vector<6x6xf32>
      %c0_12 = arith.constant 0 : index
      %c0_13 = arith.constant 0 : index
      %20 = vector.load %arg9[%c0_12, %c0_13] : memref<6x2xf32, #tpu.memory_space<vmem>>, vector<6x1xf32>
      %cst_14 = arith.constant dense<0xFF800000> : vector<6xf32>
      %21 = vector.multi_reduction <maximumf>, %19, %cst_14 [1] : vector<6x6xf32> to vector<6xf32>
      %22 = vector.shape_cast %21 : vector<6xf32> to vector<6x1xf32>
      %23 = arith.maximumf %20, %22 : vector<6x1xf32>
      %24 = arith.subf %20, %23 : vector<6x1xf32>
      %25 = math.exp %24 : vector<6x1xf32>
      %26 = vector.broadcast %23 : vector<6x1xf32> to vector<6x6xf32>
      %27 = arith.subf %19, %26 : vector<6x6xf32>
      %28 = math.exp %27 : vector<6x6xf32>
      %c0_15 = arith.constant 0 : index
      %c0_16 = arith.constant 0 : index
      %29 = vector.load %arg10[%c0_15, %c0_16] : memref<6x2xf32, #tpu.memory_space<vmem>>, vector<6x1xf32>
      %30 = arith.mulf %25, %29 : vector<6x1xf32>
      %cst_17 = arith.constant dense<0.000000e+00> : vector<6xf32>
      %31 = vector.multi_reduction <add>, %28, %cst_17 [1] : vector<6x6xf32> to vector<6xf32>
      %32 = vector.shape_cast %31 : vector<6xf32> to vector<6x1xf32>
      %33 = arith.addf %30, %32 : vector<6x1xf32>
      %c0_18 = arith.constant 0 : index
      %c0_19 = arith.constant 0 : index
      %34 = vector.load %arg10[%c0_18, %c0_19] : memref<6x2xf32, #tpu.memory_space<vmem>>, vector<6x1xf32>
      tpu.vector_store %arg10[%c0_18, %c0_19], %33 {strides = array<i32>} : memref<6x2xf32, #tpu.memory_space<vmem>>, vector<6x1xf32>,
      %c0_20 = arith.constant 0 : index
      %c0_21 = arith.constant 0 : index
      %35 = vector.load %arg11[%c0_20, %c0_21] : memref<6x4xf32, #tpu.memory_space<vmem>>, vector<6x2xf32>
      %36 = vector.broadcast %25 : vector<6x1xf32> to vector<6x2xf32>
      %37 = arith.mulf %36, %35 : vector<6x2xf32>
      %cst_22 = arith.constant dense<0.000000e+00> : vector<6x2xf32>
      %38 = tpu.matmul %28, %18, %cst_22 {dimension_numbers = #tpu.dot_dimension_numbers<[1], [0], [0], [1], [0, 0, 1, 1], [], []>} : vector<6x6xf32>, vector<6x2xf32>, vector<6x2xf32> -> vector<6x2xf32>
      %39 = arith.addf %37, %38 : vector<6x2xf32>
      %c0_23 = arith.constant 0 : index
      %c0_24 = arith.constant 0 : index
      %40 = vector.load %arg11[%c0_23, %c0_24] : memref<6x4xf32, #tpu.memory_space<vmem>>, vector<6x2xf32>
      tpu.vector_store %arg11[%c0_23, %c0_24], %39 {strides = array<i32>} : memref<6x4xf32, #tpu.memory_space<vmem>>, vector<6x2xf32>,
      %c0_25 = arith.constant 0 : index
      %c0_26 = arith.constant 0 : index
      %41 = vector.load %arg9[%c0_25, %c0_26] : memref<6x2xf32, #tpu.memory_space<vmem>>, vector<6x1xf32>
      tpu.vector_store %arg9[%c0_25, %c0_26], %23 {strides = array<i32>} : memref<6x2xf32, #tpu.memory_space<vmem>>, vector<6x1xf32>,
      %c0_27 = arith.constant 0 : index
      %c2 = arith.constant 2 : index
      %42 = vector.load %arg8[%c0_27, %c2] : memref<6x4xf32, #tpu.memory_space<vmem>>, vector<6x2xf32>
      %43 = vector.extract_strided_slice %15 {offsets = [0, 2], sizes = [6, 2], strides = [1, 1]} : vector<6x8xf32> to vector<6x2xf32>
      %44 = vector.extract_strided_slice %15 {offsets = [0, 6], sizes = [6, 2], strides = [1, 1]} : vector<6x8xf32> to vector<6x2xf32>
      %cst_28 = arith.constant dense<0.000000e+00> : vector<6x6xf32>
      %45 = tpu.matmul %42, %43, %cst_28 {dimension_numbers = #tpu.dot_dimension_numbers<[1], [1], [0], [0], [0, 0, 1, 0], [], []>} : vector<6x2xf32>, vector<6x2xf32>, vector<6x6xf32> -> vector<6x6xf32>
      %c0_29 = arith.constant 0 : index
      %c1 = arith.constant 1 : index
      %46 = vector.load %arg9[%c0_29, %c1] : memref<6x2xf32, #tpu.memory_space<vmem>>, vector<6x1xf32>
      %cst_30 = arith.constant dense<0xFF800000> : vector<6xf32>
      %47 = vector.multi_reduction <maximumf>, %45, %cst_30 [1] : vector<6x6xf32> to vector<6xf32>
      %48 = vector.shape_cast %47 : vector<6xf32> to vector<6x1xf32>
      %49 = arith.maximumf %46, %48 : vector<6x1xf32>
      %50 = arith.subf %46, %49 : vector<6x1xf32>
      %51 = math.exp %50 : vector<6x1xf32>
      %52 = vector.broadcast %49 : vector<6x1xf32> to vector<6x6xf32>
      %53 = arith.subf %45, %52 : vector<6x6xf32>
      %54 = math.exp %53 : vector<6x6xf32>
      %c0_31 = arith.constant 0 : index
      %c1_32 = arith.constant 1 : index
      %55 = vector.load %arg10[%c0_31, %c1_32] : memref<6x2xf32, #tpu.memory_space<vmem>>, vector<6x1xf32>
      %56 = arith.mulf %51, %55 : vector<6x1xf32>
      %cst_33 = arith.constant dense<0.000000e+00> : vector<6xf32>
      %57 = vector.multi_reduction <add>, %54, %cst_33 [1] : vector<6x6xf32> to vector<6xf32>
      %58 = vector.shape_cast %57 : vector<6xf32> to vector<6x1xf32>
      %59 = arith.addf %56, %58 : vector<6x1xf32>
      %c0_34 = arith.constant 0 : index
      %c1_35 = arith.constant 1 : index
      %60 = vector.load %arg10[%c0_34, %c1_35] : memref<6x2xf32, #tpu.memory_space<vmem>>, vector<6x1xf32>
      tpu.vector_store %arg10[%c0_34, %c1_35], %59 {strides = array<i32>} : memref<6x2xf32, #tpu.memory_space<vmem>>, vector<6x1xf32>,
      %c0_36 = arith.constant 0 : index
      %c2_37 = arith.constant 2 : index
      %61 = vector.load %arg11[%c0_36, %c2_37] : memref<6x4xf32, #tpu.memory_space<vmem>>, vector<6x2xf32>
      %62 = vector.broadcast %51 : vector<6x1xf32> to vector<6x2xf32>
      %63 = arith.mulf %62, %61 : vector<6x2xf32>
      %cst_38 = arith.constant dense<0.000000e+00> : vector<6x2xf32>
      %64 = tpu.matmul %54, %44, %cst_38 {dimension_numbers = #tpu.dot_dimension_numbers<[1], [0], [0], [1], [0, 0, 1, 1], [], []>} : vector<6x6xf32>, vector<6x2xf32>, vector<6x2xf32> -> vector<6x2xf32>
      %65 = arith.addf %63, %64 : vector<6x2xf32>
      %c0_39 = arith.constant 0 : index
      %c2_40 = arith.constant 2 : index
      %66 = vector.load %arg11[%c0_39, %c2_40] : memref<6x4xf32, #tpu.memory_space<vmem>>, vector<6x2xf32>
      tpu.vector_store %arg11[%c0_39, %c2_40], %65 {strides = array<i32>} : memref<6x4xf32, #tpu.memory_space<vmem>>, vector<6x2xf32>,
      %c0_41 = arith.constant 0 : index
      %c1_42 = arith.constant 1 : index
      %67 = vector.load %arg9[%c0_41, %c1_42] : memref<6x2xf32, #tpu.memory_space<vmem>>, vector<6x1xf32>
      tpu.vector_store %arg9[%c0_41, %c1_42], %49 {strides = array<i32>} : memref<6x2xf32, #tpu.memory_space<vmem>>, vector<6x1xf32>,
    } else {
    }
    %6 = arith.cmpi eq, %arg2, %arg1 : i32
    %7 = arith.extui %6 : i1 to i32
    %c0_i32_2 = arith.constant 0 : i32
    %8 = arith.cmpi ne, %7, %c0_i32_2 : i32
    scf.if %8 {
      %c0 = arith.constant 0 : index
      %c0_5 = arith.constant 0 : index
      %c0_6 = arith.constant 0 : index
      %12 = vector.load %arg4[%c0, %c0_5, %c0_6] : memref<1x6x3xf32, #tpu.memory_space<vmem>>, vector<1x6x3xf32>
      %13 = vector.shape_cast %12 : vector<1x6x3xf32> to vector<6x3xf32>
      %c0_7 = arith.constant 0 : index
      %c0_8 = arith.constant 0 : index
      %14 = vector.load %arg6[%c0_7, %c0_8] : memref<3x8xf32, #tpu.memory_space<vmem>>, vector<3x8xf32>
      %cst = arith.constant dense<0.000000e+00> : vector<6x8xf32>
      %15 = tpu.matmul %13, %14, %cst {dimension_numbers = #tpu.dot_dimension_numbers<[1], [0], [0], [1], [0, 0, 1, 1], [], []>} : vector<6x3xf32>, vector<3x8xf32>, vector<6x8xf32> -> vector<6x8xf32>
      %16 = tpu.iota {dimensions = array<i32: 0>} : vector<6x6xi32>
      %17 = tpu.iota {dimensions = array<i32: 1>} : vector<6x6xi32>
      %18 = arith.cmpi sle, %17, %16 : vector<6x6xi32>
      %c0_9 = arith.constant 0 : index
      %c0_10 = arith.constant 0 : index
      %19 = vector.load %arg8[%c0_9, %c0_10] : memref<6x4xf32, #tpu.memory_space<vmem>>, vector<6x2xf32>
      %20 = vector.extract_strided_slice %15 {offsets = [0, 0], sizes = [6, 2], strides = [1, 1]} : vector<6x8xf32> to vector<6x2xf32>
      %21 = vector.extract_strided_slice %15 {offsets = [0, 4], sizes = [6, 2], strides = [1, 1]} : vector<6x8xf32> to vector<6x2xf32>
      %cst_11 = arith.constant dense<0.000000e+00> : vector<6x6xf32>
      %22 = tpu.matmul %19, %20, %cst_11 {dimension_numbers = #tpu.dot_dimension_numbers<[1], [1], [0], [0], [0, 0, 1, 0], [], []>} : vector<6x2xf32>, vector<6x2xf32>, vector<6x6xf32> -> vector<6x6xf32>
      %cst_12 = arith.constant -1.000000e+30 : f32
      %23 = vector.broadcast %cst_12 : f32 to vector<6x6xf32>
      %24 = arith.select %18, %22, %23 : vector<6x6xi1>, vector<6x6xf32>
      %c0_13 = arith.constant 0 : index
      %c0_14 = arith.constant 0 : index
      %25 = vector.load %arg9[%c0_13, %c0_14] : memref<6x2xf32, #tpu.memory_space<vmem>>, vector<6x1xf32>
      %cst_15 = arith.constant dense<0xFF800000> : vector<6xf32>
      %26 = vector.multi_reduction <maximumf>, %24, %cst_15 [1] : vector<6x6xf32> to vector<6xf32>
      %27 = vector.shape_cast %26 : vector<6xf32> to vector<6x1xf32>
      %28 = arith.maximumf %25, %27 : vector<6x1xf32>
      %29 = arith.subf %25, %28 : vector<6x1xf32>
      %30 = math.exp %29 : vector<6x1xf32>
      %31 = vector.broadcast %28 : vector<6x1xf32> to vector<6x6xf32>
      %32 = arith.subf %24, %31 : vector<6x6xf32>
      %33 = math.exp %32 : vector<6x6xf32>
      %c0_16 = arith.constant 0 : index
      %c0_17 = arith.constant 0 : index
      %34 = vector.load %arg10[%c0_16, %c0_17] : memref<6x2xf32, #tpu.memory_space<vmem>>, vector<6x1xf32>
      %35 = arith.mulf %30, %34 : vector<6x1xf32>
      %cst_18 = arith.constant dense<0.000000e+00> : vector<6xf32>
      %36 = vector.multi_reduction <add>, %33, %cst_18 [1] : vector<6x6xf32> to vector<6xf32>
      %37 = vector.shape_cast %36 : vector<6xf32> to vector<6x1xf32>
      %38 = arith.addf %35, %37 : vector<6x1xf32>
      %c0_19 = arith.constant 0 : index
      %c0_20 = arith.constant 0 : index
      %39 = vector.load %arg10[%c0_19, %c0_20] : memref<6x2xf32, #tpu.memory_space<vmem>>, vector<6x1xf32>
      tpu.vector_store %arg10[%c0_19, %c0_20], %38 {strides = array<i32>} : memref<6x2xf32, #tpu.memory_space<vmem>>, vector<6x1xf32>,
      %c0_21 = arith.constant 0 : index
      %c0_22 = arith.constant 0 : index
      %40 = vector.load %arg11[%c0_21, %c0_22] : memref<6x4xf32, #tpu.memory_space<vmem>>, vector<6x2xf32>
      %41 = vector.broadcast %30 : vector<6x1xf32> to vector<6x2xf32>
      %42 = arith.mulf %41, %40 : vector<6x2xf32>
      %cst_23 = arith.constant dense<0.000000e+00> : vector<6x2xf32>
      %43 = tpu.matmul %33, %21, %cst_23 {dimension_numbers = #tpu.dot_dimension_numbers<[1], [0], [0], [1], [0, 0, 1, 1], [], []>} : vector<6x6xf32>, vector<6x2xf32>, vector<6x2xf32> -> vector<6x2xf32>
      %44 = arith.addf %42, %43 : vector<6x2xf32>
      %c0_24 = arith.constant 0 : index
      %c0_25 = arith.constant 0 : index
      %45 = vector.load %arg11[%c0_24, %c0_25] : memref<6x4xf32, #tpu.memory_space<vmem>>, vector<6x2xf32>
      tpu.vector_store %arg11[%c0_24, %c0_25], %44 {strides = array<i32>} : memref<6x4xf32, #tpu.memory_space<vmem>>, vector<6x2xf32>,
      %c0_26 = arith.constant 0 : index
      %c0_27 = arith.constant 0 : index
      %46 = vector.load %arg9[%c0_26, %c0_27] : memref<6x2xf32, #tpu.memory_space<vmem>>, vector<6x1xf32>
      tpu.vector_store %arg9[%c0_26, %c0_27], %28 {strides = array<i32>} : memref<6x2xf32, #tpu.memory_space<vmem>>, vector<6x1xf32>,
      %c0_28 = arith.constant 0 : index
      %c2 = arith.constant 2 : index
      %47 = vector.load %arg8[%c0_28, %c2] : memref<6x4xf32, #tpu.memory_space<vmem>>, vector<6x2xf32>
      %48 = vector.extract_strided_slice %15 {offsets = [0, 2], sizes = [6, 2], strides = [1, 1]} : vector<6x8xf32> to vector<6x2xf32>
      %49 = vector.extract_strided_slice %15 {offsets = [0, 6], sizes = [6, 2], strides = [1, 1]} : vector<6x8xf32> to vector<6x2xf32>
      %cst_29 = arith.constant dense<0.000000e+00> : vector<6x6xf32>
      %50 = tpu.matmul %47, %48, %cst_29 {dimension_numbers = #tpu.dot_dimension_numbers<[1], [1], [0], [0], [0, 0, 1, 0], [], []>} : vector<6x2xf32>, vector<6x2xf32>, vector<6x6xf32> -> vector<6x6xf32>
      %cst_30 = arith.constant -1.000000e+30 : f32
      %51 = vector.broadcast %cst_30 : f32 to vector<6x6xf32>
      %52 = arith.select %18, %50, %51 : vector<6x6xi1>, vector<6x6xf32>
      %c0_31 = arith.constant 0 : index
      %c1 = arith.constant 1 : index
      %53 = vector.load %arg9[%c0_31, %c1] : memref<6x2xf32, #tpu.memory_space<vmem>>, vector<6x1xf32>
      %cst_32 = arith.constant dense<0xFF800000> : vector<6xf32>
      %54 = vector.multi_reduction <maximumf>, %52, %cst_32 [1] : vector<6x6xf32> to vector<6xf32>
      %55 = vector.shape_cast %54 : vector<6xf32> to vector<6x1xf32>
      %56 = arith.maximumf %53, %55 : vector<6x1xf32>
      %57 = arith.subf %53, %56 : vector<6x1xf32>
      %58 = math.exp %57 : vector<6x1xf32>
      %59 = vector.broadcast %56 : vector<6x1xf32> to vector<6x6xf32>
      %60 = arith.subf %52, %59 : vector<6x6xf32>
      %61 = math.exp %60 : vector<6x6xf32>
      %c0_33 = arith.constant 0 : index
      %c1_34 = arith.constant 1 : index
      %62 = vector.load %arg10[%c0_33, %c1_34] : memref<6x2xf32, #tpu.memory_space<vmem>>, vector<6x1xf32>
      %63 = arith.mulf %58, %62 : vector<6x1xf32>
      %cst_35 = arith.constant dense<0.000000e+00> : vector<6xf32>
      %64 = vector.multi_reduction <add>, %61, %cst_35 [1] : vector<6x6xf32> to vector<6xf32>
      %65 = vector.shape_cast %64 : vector<6xf32> to vector<6x1xf32>
      %66 = arith.addf %63, %65 : vector<6x1xf32>
      %c0_36 = arith.constant 0 : index
      %c1_37 = arith.constant 1 : index
      %67 = vector.load %arg10[%c0_36, %c1_37] : memref<6x2xf32, #tpu.memory_space<vmem>>, vector<6x1xf32>
      tpu.vector_store %arg10[%c0_36, %c1_37], %66 {strides = array<i32>} : memref<6x2xf32, #tpu.memory_space<vmem>>, vector<6x1xf32>,
      %c0_38 = arith.constant 0 : index
      %c2_39 = arith.constant 2 : index
      %68 = vector.load %arg11[%c0_38, %c2_39] : memref<6x4xf32, #tpu.memory_space<vmem>>, vector<6x2xf32>
      %69 = vector.broadcast %58 : vector<6x1xf32> to vector<6x2xf32>
      %70 = arith.mulf %69, %68 : vector<6x2xf32>
      %cst_40 = arith.constant dense<0.000000e+00> : vector<6x2xf32>
      %71 = tpu.matmul %61, %49, %cst_40 {dimension_numbers = #tpu.dot_dimension_numbers<[1], [0], [0], [1], [0, 0, 1, 1], [], []>} : vector<6x6xf32>, vector<6x2xf32>, vector<6x2xf32> -> vector<6x2xf32>
      %72 = arith.addf %70, %71 : vector<6x2xf32>
      %c0_41 = arith.constant 0 : index
      %c2_42 = arith.constant 2 : index
      %73 = vector.load %arg11[%c0_41, %c2_42] : memref<6x4xf32, #tpu.memory_space<vmem>>, vector<6x2xf32>
      tpu.vector_store %arg11[%c0_41, %c2_42], %72 {strides = array<i32>} : memref<6x4xf32, #tpu.memory_space<vmem>>, vector<6x2xf32>,
      %c0_43 = arith.constant 0 : index
      %c1_44 = arith.constant 1 : index
      %74 = vector.load %arg9[%c0_43, %c1_44] : memref<6x2xf32, #tpu.memory_space<vmem>>, vector<6x1xf32>
      tpu.vector_store %arg9[%c0_43, %c1_44], %56 {strides = array<i32>} : memref<6x2xf32, #tpu.memory_space<vmem>>, vector<6x1xf32>,
    } else {
    }
    %c0_i32_3 = arith.constant 0 : i32
    %9 = arith.cmpi eq, %arg2, %c0_i32_3 : i32
    %10 = arith.extui %9 : i1 to i32
    %c0_i32_4 = arith.constant 0 : i32
    %11 = arith.cmpi ne, %10, %c0_i32_4 : i32
    scf.if %11 {
      %c0 = arith.constant 0 : index
      %c0_5 = arith.constant 0 : index
      %12 = vector.load %arg10[%c0, %c0_5] : memref<6x2xf32, #tpu.memory_space<vmem>>, vector<6x1xf32>
      %13 = tpu.reciprocal %12 : vector<6x1xf32> -> vector<6x1xf32>
      %c0_6 = arith.constant 0 : index
      %c0_7 = arith.constant 0 : index
      %14 = vector.load %arg11[%c0_6, %c0_7] : memref<6x4xf32, #tpu.memory_space<vmem>>, vector<6x2xf32>
      %15 = vector.broadcast %13 : vector<6x1xf32> to vector<6x2xf32>
      %16 = arith.mulf %14, %15 : vector<6x2xf32>
      %c0_8 = arith.constant 0 : index
      %c1 = arith.constant 1 : index
      %17 = vector.load %arg10[%c0_8, %c1] : memref<6x2xf32, #tpu.memory_space<vmem>>, vector<6x1xf32>
      %18 = tpu.reciprocal %17 : vector<6x1xf32> -> vector<6x1xf32>
      %c0_9 = arith.constant 0 : index
      %c2 = arith.constant 2 : index
      %19 = vector.load %arg11[%c0_9, %c2] : memref<6x4xf32, #tpu.memory_space<vmem>>, vector<6x2xf32>
      %20 = vector.broadcast %18 : vector<6x1xf32> to vector<6x2xf32>
      %21 = arith.mulf %19, %20 : vector<6x2xf32>
      %22 = tpu.concatenate %16, %21 in 1 : vector<6x2xf32>, vector<6x2xf32> -> vector<6x4xf32>
      %c0_10 = arith.constant 0 : index
      %c0_11 = arith.constant 0 : index
      %c0_12 = arith.constant 0 : index
      %23 = vector.load %arg7[%c0_10, %c0_11, %c0_12] : memref<1x6x4xf32, #tpu.memory_space<vmem>>, vector<1x6x4xf32>
      %24 = vector.shape_cast %23 : vector<1x6x4xf32> to vector<6x4xf32>
      %25 = vector.shape_cast %22 : vector<6x4xf32> to vector<1x6x4xf32>
      tpu.vector_store %arg7[%c0_10, %c0_11, %c0_12], %25 {strides = array<i32>} : memref<1x6x4xf32, #tpu.memory_space<vmem>>, vector<1x6x4xf32>,
    } else {
    }
    return
  }
  func.func @transform_0(%arg0: i32, %arg1: i32, %arg2: i32) -> (i32, i32, i32) {
    %c0_i32 = arith.constant 0 : i32
    %c0_i32_0 = arith.constant 0 : i32
    return %arg0, %arg1, %c0_i32 : i32, i32, i32
  }
  func.func @transform_1(%arg0: i32, %arg1: i32, %arg2: i32) -> (i32, i32, i32) {
    %c0_i32 = arith.constant 0 : i32
    %c0_i32_0 = arith.constant 0 : i32
    return %arg0, %arg2, %c0_i32 : i32, i32, i32
  }
  func.func @transform_2(%arg0: i32, %arg1: i32, %arg2: i32) -> (i32, i32) {
    %c0_i32 = arith.constant 0 : i32
    %c0_i32_0 = arith.constant 0 : i32
    %c0_i32_1 = arith.constant 0 : i32
    return %c0_i32, %c0_i32_0 : i32, i32
  }
  func.func @transform_3(%arg0: i32, %arg1: i32, %arg2: i32) -> (i32, i32) {
    %c0_i32 = arith.constant 0 : i32
    %c0_i32_0 = arith.constant 0 : i32
    %c0_i32_1 = arith.constant 0 : i32
    return %c0_i32, %c0_i32_0 : i32, i32
  }
  func.func @transform_4(%arg0: i32, %arg1: i32, %arg2: i32) -> (i32, i32, i32) {
    %c0_i32 = arith.constant 0 : i32
    %c0_i32_0 = arith.constant 0 : i32
    return %arg0, %arg1, %c0_i32 : i32, i32, i32
  }
}

</mosaic_0001>

<bundles_post_ra>
// kernel: tpu_custom_call.1
= control target key start
LH: loop header
LB: loop body
LE: loop exit
PB: predicated region body
PF: predicated region fallthrough
CT: control target
= control target key end

     0   :  { %s1595_s15 = smov 0   ;;  %s1597_s16 = smov 0   ;;  %s1683_s0 = inlined_call_operand.vmem [shape: f32[2,6,3], index: 0, kind: input, shape index: {}]   ;;  %s1684_s1 = inlined_call_operand.vmem [shape: f32[2,6,3], index: 1, kind: input, shape index: {}]   ;;  %s1685_s2 = inlined_call_operand.vmem [shape: f32[3,4], index: 2, kind: input, shape index: {}]   ;;  %s1686_s3 = inlined_call_operand.vmem [shape: f32[3,8], index: 3, kind: input, shape index: {}]   ;;  %s1687_s4 = inlined_call_operand.vmem [shape: f32[2,6,4], index: 4, kind: output, shape index: {}]  }
   0x1   :  { %s1599_s17 = smov 0  }
   0x2 LB: > { %s33_s18 = sadd.s32 1, %s1555_s16  ;;  %p1420_p0 = scmp.ge.s32.totalorder %s1559_s17, 1  ;;  %s1559_s17 = sphi %s1599_s17, %s14_s17   ;;  %s1555_s16 = sphi %s1597_s16, %s1689_s16   ;;  %s1551_s15 = sphi %s1595_s15, %s1688_s15  }
   0x3   : > { %p35_p1 = scmp.ge.s32.totalorder %s33_s18, 2  ;;  %p201_p2 = scmp.lt.s32.totalorder %s1559_s17, 3 }
   0x5   : > { %s1691_s18 = smov (%p35_p1, %s33_s18), 0  ;;  %p202_p3 = pnand %p1420_p0, %p201_p2 }
   0x6   : > { %v264_v0 = vld [vmem:[%s1685_s2] sm:$0x7] (!%p202_p3)  ;;  %vm269_vm0 = vcmask (!%p202_p3), 1042432   ;;  %p238_p4 = scmp.lt.s32.totalorder (!%p202_p3), %s1551_s15, 1  ;;  %v1561_v1 = vmov (!%p202_p3), 0.0   ;;  %vm1562_vm1 = vmmov (!%p202_p3), 0   ;;  %v907_v14 = vlaneseq (!%p202_p3) }
   0x7   : > { %205 = sbr.rel (%p202_p3) target bundleno = 1204 (0x4b4), region = 36  ;;  %1460 = vmatprep.subr.mxu0 (!%p202_p3), %v1561_v1  ;;  %1462 = vmatprep.mubr.msk.f32.mxu0 (!%p202_p3), %vm1562_vm1, %v1561_v1  ;;  %v828_v2 = vld [vmem:[%s1686_s3] sm:$0x7] (!%p202_p3)  ;;  %vm265_vm2 = vcmask (!%p202_p3), 23552   ;;  %vm344_vm3 = vcmask (!%p202_p3), 29696   ;;  %vm913_vm4 = vcmask (!%p202_p3), 15360  }
   0x8   : > { %1461 = vmatpush3.msk.msra.mxu0 (!%p202_p3), %vm269_vm0, %v264_v0  ;;  %1465 = vmatprep.subr.mxu1 (!%p202_p3), %v1561_v1  ;;  %349 = vst.msk [vmem:[#allocation5] sm:$0x3f] (!%p202_p3), %vm344_vm3, %v1561_v1  ;;  %s1563_s30 = smov (!%p202_p3), 126   ;;  %vm346_vm5 = vcmask (!%p202_p3), 13312   ;;  %v1564_v15 = vmov (!%p202_p3), -1e+30  }
   0x9   : > { %1466 = vmatpush3.msk.msra.mxu1 (!%p202_p3), %vm269_vm0, %v828_v2  ;;  %1467 = vmatprep.mubr.msk.f32.mxu1 (!%p202_p3), %vm1562_vm1, %v1561_v1  ;;  %347 = vst.msk [vmem:[#allocation3] sm:$0x3f] (!%p202_p3), %vm346_vm5, %v1564_v15  ;;  %348 = vst.msk [vmem:[#allocation4] sm:$0x3f] (!%p202_p3), %vm346_vm5, %v1561_v1  ;;  %v908_v16 = vshrl.u32 (!%p202_p3), %v907_v14, 7  ;;  %v910_v17 = vand.u32 (!%p202_p3), 127, %v907_v14 }
   0xa   : > { %1470 = vmatprep.subr.mxu0 (!%p202_p3), %v1561_v1  ;;  %1475 = vmatprep.subr.mxu1 (!%p202_p3), %v1561_v1  ;;  %vm992_vm7 = vcmask (!%p202_p3), 46080   ;;  %v1565_v22 = vmov (!%p202_p3), 0   ;;  %v1566_v27 = vmov (!%p202_p3), 1   ;;  %vm1014_vm8 = vcmask (!%p202_p3), 5120   ;;  %s1567_s5 = smov (!%p202_p3), 124   ;;  %s1568_s6 = smov (!%p202_p3), 122  }
   0xb   : > { %vm911_vm6 = vcmp.le.s32.totalorder (!%p202_p3), %v910_v17, %v908_v16  ;;  %1523 = vset.pattern.permute.xlu0 (!%p202_p3), %v1565_v22  ;;  %1524 = vset.pattern.permute.xlu1 (!%p202_p3), %v1566_v27  ;;  %vm1209_vm9 = vcmask (!%p202_p3), 13320   ;;  %vm1029_vm10 = vcmask (!%p202_p3), 1045504   ;;  %vm1025_vm11 = vcmask (!%p202_p3), 48128   ;;  %s1569_s7 = smov (!%p202_p3), 2  }
   0xc   : > { %vm1300_vm12 = vcmask (!%p202_p3), 29712  }
   0xe   : > { %s1693_s15 = smov (!%p238_p4, %s1551_s15), 1 }
   0xf   : > { %s1625_s23 = sshll.u32 %s1693_s15, 3  ;;  %v1016_v56 = vld [vmem:[#allocation5] sm:$0x3f] }
  0x10   : > { %s244_s26 = scalar_lea.vmem %s1683_s0, %s1625_s23  ;;  %s251_s29 = scalar_lea.vmem %s1684_s1, %s1625_s23  ;;  %v991_v28 = vld [vmem:[#allocation3] sm:$0x3f]  ;;  %v1008_v52 = vld [vmem:[#allocation4] sm:$0x3f] }
  0x11   : > { %v263_v3 = vld [vmem:[%s244_s26] sm:$0x3f]  ;;  %s258_s10 = scalar_lea.vmem %s1687_s4, %s1625_s23 }
  0x12   : > { %1463 = vmatmul.mubr.msk.f32.vlgmr.msra.gmra.mrb[0].mxu0 %vm265_vm2, %v263_v3  ;;  %v827_v4 = vld [vmem:[%s251_s29] sm:$0x3f] }
  0x13   : > { %1468 = vmatmul.mubr.msk.f32.vlgmr.msra.gmra.mrb[0].mxu1 %vm265_vm2, %v827_v4  ;;  %1472 = vmatprep.mubr.msk.f32.mxu0 %vm1562_vm1, %v1561_v1 }
  0x14   : > { %1477 = vmatprep.mubr.msk.f32.mxu1 %vm1562_vm1, %v1561_v1 }
  0xe5   : > { %v339_v5 = vpop.f32.mrb[0].mxu0 }
  0xe6   : > { %v343_v6 = vmul.f32 0.70710677, %v339_v5  ;;  %v1464_v7 = vpop.f32.mrb[1].mxu0  ;;  %v903_v8 = vpop.f32.mrb[0].mxu1 }
  0xe7   : > { %v1469_v9 = vpop.f32.mrb[1].mxu1  ;;  %1110 = vrot.lane.b32.xlu0 %v903_v8, %s1563_s30  ;;  %1471 = vmatpush3.xpose.msk.msra.mxu0 %vm913_vm4, %v903_v8 }
  0xe8   : > { %345 = vst.msk [vmem:[#allocation2] sm:$0x3f] %vm344_vm3, %v343_v6  ;;  %1480 = vmatprep.subr.mxu0 %v1561_v1 }
  0xef   : > { %v1106_v10 = vld [vmem:[#allocation2] sm:$0x3f] }
  0xf0   : > { %v912_v11 = vld [vmem:[#allocation2] sm:$0x3f]  ;;  %1108 = vrot.lane.b32.xlu0 %v1106_v10, %s1563_s30 }
  0xf1   : > { %1473 = vmatmul.mubr.msk.f32.vlgmr.msra.gmra.mrb[2].mxu0 %vm913_vm4, %v912_v11 }
  0xf2   : > { %1482 = vmatprep.mubr.msk.f32.mxu0 %vm1562_vm1, %v1561_v1 }
 0x159   : > { %v1111_v12 = vpop.permute.xlu0 %1110 }
 0x15a   : > { %1481 = vmatpush3.xpose.msk.msra.mxu0 %vm913_vm4, %v1111_v12 }
 0x162   : > { %v1109_v13 = vpop.permute.xlu0 %1108 }
 0x163   : > { %1483 = vmatmul.mubr.msk.f32.vlgmr.msra.gmra.mrb[4].mxu0 %vm913_vm4, %v1109_v13 }
 0x1c4   : > { %v986_v18 = vpop.f32.mrb[2].mxu0 }
 0x1c5   : > { %v990_v19 = vsel %vm911_vm6, %v986_v18, -1e+30  ;;  %v1474_v20 = vpop.f32.mrb[3].mxu0 }
 0x1c6   : > { %v993_v21 = vsel %vm992_vm7, %v990_v19, -inf }
 0x1c7   : > { %994 = vmax.xlane.f32.xlu1 %v993_v21 }
 0x236   : > { %v1182_v23 = vpop.f32.mrb[4].mxu0 }
 0x237   : > { %v1186_v24 = vsel %vm911_vm6, %v1182_v23, -1e+30  ;;  %v1484_v25 = vpop.f32.mrb[5].mxu0 }
 0x238   : > { %v1188_v26 = vsel %vm992_vm7, %v1186_v24, -inf }
 0x239   : > { %1189 = vmax.xlane.f32.xlu1 %v1188_v26 }
 0x254   : > { %v995_v29 = vpop.xlane.xlu1 %994 }
 0x255   : > { %v996_v30 = vmax.f32 %v991_v28, %v995_v29 }
 0x257   : > { %1105 = vst.msk [vmem:[#allocation3] sm:$0x3f] %vm1014_vm8, %v996_v30  ;;  %1002 = vperm.xlu0 %1523, %v996_v30   ;;  %v997_v42 = vsub.f32 %v991_v28, %v996_v30 }
 0x259   : > { %v998_v43 = vmul.f32 1.442695, %v997_v42 }
 0x25b   : > { %1023 = vrot.lane.b32.xlu0 %v903_v8, %s1567_s5 }
 0x25e   : > { %v1187_v31 = vld [vmem:[#allocation3] sm:$0x3f] }
 0x25f   : > { %1218 = vrot.lane.b32.xlu0 %v903_v8, %s1568_s6 }
 0x2c6   : > { %v1190_v32 = vpop.xlane.xlu1 %1189 }
 0x2c7   : > { %v1191_v33 = vmax.f32 %v1187_v31, %v1190_v32 }
 0x2c9   : > { %v1192_v34 = vsub.f32 %v1187_v31, %v1191_v33  ;;  %1302 = vst.msk [vmem:[#allocation3] sm:$0x3f] %vm1209_vm9, %v1191_v33  ;;  %1197 = vperm.xlu1 %1524, %v1191_v33  }
 0x2cb   : > { %v1193_v50 = vmul.f32 1.442695, %v1192_v34 }
 0x2d6   : > { %v1003_v35 = vpop.permute.xlu0 %1002 }
 0x2d7   : > { %v1005_v36 = vsub.f32 %v990_v19, %v1003_v35 }
 0x2d9   : > { %v1006_v37 = vmul.f32 1.442695, %v1005_v36 }
 0x2da   : > { %v1024_v38 = vpop.permute.xlu0 %1023 }
 0x2db   : > { %1527 = vpow2.f32 %v1006_v37  ;;  %1476 = vmatpush3.msk.msra.mxu1 %vm1029_vm10, %v1024_v38 }
 0x2dc   : > { %1485 = vmatprep.subr.mxu1 %v1561_v1  ;;  %1529 = vpow2.f32 %v998_v43 }
 0x2de   : > { %v1219_v40 = vpop.permute.xlu0 %1218 }
 0x2e5   : > { %v1528_v39 = vpop.eup %1527 }
 0x2e6   : > { %1478 = vmatmul.mubr.msk.f32.vlgmr.msra.gmra.mrb[2].mxu1 %vm1025_vm11, %v1528_v39  ;;  %v1010_v41 = vsel %vm992_vm7, %v1528_v39, 0.0  ;;  %v1530_v44 = vpop.eup %1529 }
 0x2e7   : > { %1486 = vmatpush3.msk.msra.mxu1 %vm1029_vm10, %v1219_v40  ;;  %1011 = vadd.xlane.f32.xlu0 %v1010_v41  ;;  %v1009_v53 = vmul.f32 %v1530_v44, %v1008_v52 }
 0x2e8   : > { %1487 = vmatprep.mubr.msk.f32.mxu1 %vm1562_vm1, %v1561_v1 }
 0x2fd   : > { %1019 = vperm.xlu0 %1523, %v1530_v44  }
 0x301   : > { %1526 = vset.pattern.permute.xlu0 %v1566_v27 }
 0x348   : > { %v1198_v45 = vpop.permute.xlu1 %1197 }
 0x349   : > { %v1200_v46 = vsub.f32 %v1186_v24, %v1198_v45 }
 0x34b   : > { %v1201_v47 = vmul.f32 1.442695, %v1200_v46 }
 0x34d   : > { %1531 = vpow2.f32 %v1201_v47 }
 0x34e   : > { %1533 = vpow2.f32 %v1193_v50 }
 0x357   : > { %v1532_v48 = vpop.eup %1531 }
 0x358   : > { %1488 = vmatmul.mubr.msk.f32.vlgmr.msra.gmra.mrb[4].mxu1 %vm1025_vm11, %v1532_v48  ;;  %v1205_v49 = vsel %vm992_vm7, %v1532_v48, 0.0  ;;  %v1534_v51 = vpop.eup %1533 }
 0x359   : > { %1206 = vadd.xlane.f32.xlu1 %v1205_v49 }
 0x36a   : > { %1214 = vperm.xlu1 %1524, %v1534_v51  }
 0x36e   : > { %1525 = vset.pattern.permute.xlu1 %v1565_v22 }
 0x374   : > { %v1012_v54 = vpop.xlane.xlu0 %1011 }
 0x375   : > { %v1013_v55 = vadd.f32 %v1012_v54, %v1009_v53 }
 0x377   : > { %1015 = vst.msk [vmem:[#allocation4] sm:$0x3f] %vm1014_vm8, %v1013_v55 }
 0x37c   : > { %v1020_v57 = vpop.permute.xlu0 %1019 }
 0x37d   : > { %v1022_v58 = vmul.f32 %v1020_v57, %v1016_v56 }
 0x37e   : > { %v1203_v62 = vld [vmem:[#allocation4] sm:$0x3f] }
 0x37f   : > { %v1204_v63 = vmul.f32 %v1534_v51, %v1203_v62 }
 0x3b9   : > { %v1098_v59 = vpop.f32.mrb[2].mxu1 }
 0x3ba   : > { %v1102_v60 = vadd.f32 %v1098_v59, %v1022_v58  ;;  %v1479_v61 = vpop.f32.mrb[3].mxu1 }
 0x3bc   : > { %1104 = vst.msk [vmem:[#allocation5] sm:$0x3f] %vm346_vm5, %v1102_v60 }
 0x3c3   : > { %v1211_v7 = vld [vmem:[#allocation5] sm:$0x3f] }
 0x3e6   : > { %v1207_v0 = vpop.xlane.xlu1 %1206 }
 0x3e7   : > { %v1208_v1 = vadd.f32 %v1207_v0, %v1204_v63 }
 0x3e9   : > { %1210 = vst.msk [vmem:[#allocation4] sm:$0x3f] %vm1209_vm9, %v1208_v1 }
 0x3ea   : > { %v1215_v6 = vpop.permute.xlu1 %1214 }
 0x3eb   : > { %v1217_v8 = vmul.f32 %v1215_v6, %v1211_v7 }
 0x3f0   : > { %v1306_v2 = vld [vmem:[#allocation4] sm:$0x3f] }
 0x3f1   : > { %1535 = vrcp.f32 %v1306_v2 }
 0x3fb   : > { %v1536_v3 = vpop.eup %1535 }
 0x3fc   : > { %1311 = vperm.xlu1 %1525, %v1536_v3  }
 0x42b   : > { %v1291_v4 = vpop.f32.mrb[4].mxu1 }
 0x42c   : > { %1296 = vrot.lane.b32.xlu0 %v1291_v4, %s1569_s7  ;;  %v1489_v5 = vpop.f32.mrb[5].mxu1 }
 0x430   : > { %1316 = vperm.xlu0 %1526, %v1536_v3  }
 0x47b   : > { %v1312_v12 = vpop.permute.xlu1 %1311 }
 0x49e   : > { %v1297_v9 = vpop.permute.xlu0 %1296 }
 0x49f   : > { %v1299_v10 = vadd.f32 %v1297_v9, %v1217_v8 }
 0x4a1   : > { %1301 = vst.msk [vmem:[#allocation5] sm:$0x3f] %vm1300_vm12, %v1299_v10 }
 0x4a8   : > { %v1308_v11 = vld [vmem:[#allocation5] sm:$0x3f] }
 0x4a9   : > { %v1314_v14 = vmul.f32 %v1312_v12, %v1308_v11 }
 0x4af   : > { %v1317_v13 = vpop.permute.xlu0 %1316 }
 0x4b0   : > { %v1319_v15 = vmul.f32 %v1317_v13, %v1308_v11 }
 0x4b2   : > { %v1321_v16 = vsel %vm913_vm4, %v1314_v14, %v1319_v15 }
 0x4b3   : > { %1323 = vst.msk [vmem:[%s258_s10] sm:$0x3f] %vm344_vm3, %v1321_v16 }
 0x4b4 PF: > { %s14_s17 = sadd.s32 1, %s1559_s17   ;;  %s1688_s15 = smov %s1555_s16 }
 0x4b5   : > { %p11_p5 = scmp.ge.s32.totalorder %s14_s17, 4   ;;  %s1689_s16 = smov %s1691_s18 }
 0x4b7   :  { %13 = sbr.rel (!%p11_p5) target bundleno = 2 (0x2), region = 85 }

</bundles_post_ra>
